<compile_context>
chip_gen: v7x
topology: tpu7x:2x2x1
jax: 0.10.0
libtpu: 0.0.40
codegen_flags: <defaults>
</compile_context>

<pallas_src>
import jax
import jax.numpy as jnp
from jax.experimental import pallas as pl
from jax.experimental.pallas import tpu as pltpu


PATCH = 8            # stem conv kernel == stride (output stride 8)
KIN = PATCH * PATCH  # 64 (single input channel)
STEM_CH = 64
DEC_CH = 128         # decoder_channels=128
OUT_CH = 3           # classes=3
CLS_PAD = 128        # classifier output padded to a lane-dense 128-wide slab
UPSAMPLE = 8         # upsampling=8


def _round_up(x, m):
    return ((x + m - 1) // m) * m


# -----------------------------------------------------------------------------
# Kernel 1: global statistics (single pass), matching
#   x.mean()  and  x.std() (unbiased)  over the whole channel-sliced tensor.
# Grid = (2 [parallel half, for v7x's 2 TCs], tiles-per-half [arbitrary]).
# Each step adds sublane-grouped partial sums into a resident (8, W) block;
# the tiny cross-lane finish happens in the wrapper.
# -----------------------------------------------------------------------------
def global_stats(x0):
    """x0: [N, 1, H, W] f32.  Returns (mean, inv) with inv = 1/(std + 1e-6)."""
    N, C, H, W = x0.shape
    rows = N * C * H
    total = rows * W
    x2d = x0.reshape(rows, W)

    # Row tile: multiple of 8, capped so a tile stays <= ~2 MiB and each of the
    # two halves gets at least one real tile.
    tr_cap = max(8, min(512, ((1 << 21) // max(W * 4, 1)) // 8 * 8))
    tr = max(8, min(tr_cap, _round_up(pl.cdiv(rows, 2), 8)))
    n_tiles = pl.cdiv(rows, tr)
    n_half = pl.cdiv(n_tiles, 2)
    needs_mask = (rows % tr != 0) or (2 * n_half != n_tiles)

    if 2 * n_half != n_tiles:
        # Odd tile count: the very last (c=1, t=n_half-1) step would index one
        # block past the end; clamp the DMA and zero its contribution in-kernel.
        x_map = lambda c, t: (jnp.minimum(c * n_half + t, n_tiles - 1), 0)
    else:
        x_map = lambda c, t: (c * n_half + t, 0)

    def stats_kernel(x_ref, sum_ref, ssq_ref):
        c = pl.program_id(0)
        t = pl.program_id(1)

        @pl.when(t == 0)
        def _():
            sum_ref[...] = jnp.zeros(sum_ref.shape, sum_ref.dtype)
            ssq_ref[...] = jnp.zeros(ssq_ref.shape, ssq_ref.dtype)

        x = x_ref[...]
        if needs_mask:
            row0 = (c * n_half + t) * tr
            rid = jax.lax.broadcasted_iota(jnp.int32, x.shape, 0)
            x = jnp.where(row0 + rid < rows, x, 0.0)
        xr = x.reshape(tr // 8, 8, W)                 # sublane-preserving split
        sum_ref[...] += jnp.sum(xr, axis=0)           # sublane-group adds only
        ssq_ref[...] += jnp.sum(xr * xr, axis=0)

    sums, ssqs = pl.pallas_call(
        stats_kernel,
        out_shape=(jax.ShapeDtypeStruct((16, W), jnp.float32),
                   jax.ShapeDtypeStruct((16, W), jnp.float32)),
        grid=(2, n_half),
        in_specs=[pl.BlockSpec((tr, W), x_map)],
        out_specs=(pl.BlockSpec((8, W), lambda c, t: (c, 0)),
                   pl.BlockSpec((8, W), lambda c, t: (c, 0))),
        compiler_params=pltpu.CompilerParams(
            dimension_semantics=("parallel", "arbitrary")),
    )(x2d)

    n = float(total)
    s = jnp.sum(sums)
    ssq = jnp.sum(ssqs)
    mean = s / n
    # TODO(synk): E[x^2]-mean^2 in f32 can cancel for large-mean/small-std
    # inputs; a shifted sum-of-squares would be exact at the cost of a pilot.
    var = (ssq - n * mean * mean) / max(n - 1.0, 1.0)   # unbiased (torch .std())
    std = jnp.sqrt(jnp.maximum(var, 0.0))
    inv = 1.0 / (std + 1e-6)
    return mean, inv


# -----------------------------------------------------------------------------
# Kernel 2: fused head.  grid = (M tiles,) fully parallel.  All weights/biases
# are resident VMEM blocks (constant index maps -> copied once); the V stem
# variants (1 for training, 4 for TTA) are unrolled in-kernel and summed in an
# f32 register accumulator; a single bf16 store writes the lane-dense slab.
# -----------------------------------------------------------------------------
def _head_kernel(pix_ref, ws_ref, bs_ref, wd_ref, bd_ref, wc_ref, bc_ref, o_ref):
    nv = ws_ref.shape[0]
    pix = pix_ref[...]                                   # bf16 [tm, 64]
    acc = jnp.zeros(o_ref.shape, jnp.float32)
    for v in range(nv):                                  # static unroll (V<=4)
        f = jnp.dot(pix, ws_ref[v], preferred_element_type=jnp.float32)
        f = jnp.maximum(f + bs_ref[...], 0.0).astype(jnp.bfloat16)
        f = jnp.dot(f, wd_ref[...], preferred_element_type=jnp.float32)
        f = jnp.maximum(f + bd_ref[...], 0.0).astype(jnp.bfloat16)
        acc = acc + jnp.dot(f, wc_ref[...], preferred_element_type=jnp.float32)
    o_ref[...] = (acc + nv * bc_ref[...]).astype(o_ref.dtype)


def _pick_tm(M):
    for cand in (2048, 1024, 512):
        if M % cand == 0:
            return cand
    if M <= 2048:
        return max(8, _round_up(M, 8))
    return 2048


def head_logits_sum(pix, ws, bs, wd, bd, wc, bc):
    """pix: [M, 64] bf16; ws: [V, 64, STEM_CH] bf16 (stacked stem variants).
    Returns the sum over the V variants of the classifier logits, [M, 3] f32."""
    M, kin = pix.shape
    V = ws.shape[0]
    tm = _pick_tm(M)
    mp = _round_up(M, tm)
    if mp != M:
        pix = jnp.pad(pix, ((0, mp - M), (0, 0)))

    out = pl.pallas_call(
        _head_kernel,
        out_shape=jax.ShapeDtypeStruct((mp, CLS_PAD), jnp.bfloat16),
        grid=(mp // tm,),
        in_specs=[
            pl.BlockSpec((tm, kin), lambda i: (i, 0)),                 # pixels (bf16)
            pl.BlockSpec((V, kin, STEM_CH), lambda i: (0, 0, 0)),      # stem W stack
            pl.BlockSpec((1, STEM_CH), lambda i: (0, 0)),              # stem b (f32)
            pl.BlockSpec((STEM_CH, DEC_CH), lambda i: (0, 0)),         # dec W
            pl.BlockSpec((1, DEC_CH), lambda i: (0, 0)),               # dec b (f32)
            pl.BlockSpec((DEC_CH, CLS_PAD), lambda i: (0, 0)),         # cls W (padded)
            pl.BlockSpec((1, CLS_PAD), lambda i: (0, 0)),              # cls b (padded)
        ],
        out_specs=pl.BlockSpec((tm, CLS_PAD), lambda i: (i, 0)),
        compiler_params=pltpu.CompilerParams(
            dimension_semantics=("parallel",)),
    )(pix, ws, bs, wd, bd, wc, bc)
    return out[:M, :OUT_CH].astype(jnp.float32)


# -----------------------------------------------------------------------------
# Glue: params, patchify(+normalize+bf16), interp-as-matmul upsample, TTA.
# -----------------------------------------------------------------------------
def init_params(key):
    k1, k2, k3 = jax.random.split(key, 3)
    return {
        "w_stem": jax.random.normal(k1, (KIN, STEM_CH), jnp.float32) / jnp.sqrt(KIN),
        "b_stem": jnp.zeros((1, STEM_CH), jnp.float32),
        "w_dec": jax.random.normal(k2, (STEM_CH, DEC_CH), jnp.float32) / jnp.sqrt(STEM_CH),
        "b_dec": jnp.zeros((1, DEC_CH), jnp.float32),
        "w_cls": jax.random.normal(k3, (DEC_CH, OUT_CH), jnp.float32) / jnp.sqrt(DEC_CH),
        "b_cls": jnp.zeros((1, OUT_CH), jnp.float32),
    }


def _prep_head_params(params):
    """One bf16 cast / lane-pad of the tiny weights per call (negligible)."""
    bs = params["b_stem"]
    wd = params["w_dec"].astype(jnp.bfloat16)
    bd = params["b_dec"]
    wc = jnp.pad(params["w_cls"], ((0, 0), (0, CLS_PAD - OUT_CH))).astype(jnp.bfloat16)
    bc = jnp.pad(params["b_cls"], ((0, 0), (0, CLS_PAD - OUT_CH)))
    return bs, wd, bd, wc, bc


def _patchify_norm(x0, mean, inv):
    """[N,1,H,W] f32 -> normalized bf16 patches [N*(H/8)*(W/8), 64], (kh,kw) cols.
    The (x-mean)*inv affine, transpose/reshape and bf16 cast fuse into one XLA
    pass over the image.
    # TODO(synk): move the patch rearrangement into the head kernel's BlockSpec
    # to remove this remaining full-resolution pass entirely."""
    N, _, H, W = x0.shape
    h, w = H // PATCH, W // PATCH
    x = (x0.reshape(N, H, W) - mean) * inv
    x = x.reshape(N, h, PATCH, w, PATCH)
    x = jnp.transpose(x, (0, 1, 3, 2, 4))                  # N, h, w, kh, kw
    pix = x.reshape(N * h * w, KIN).astype(jnp.bfloat16)
    return pix, (N, h, w)


def _stem_flip_variants(w_stem):
    """Stem-kernel flips equivalent to input flips (stride == kernel size)."""
    w = w_stem.reshape(PATCH, PATCH, STEM_CH)       # (kh, kw, out)
    return jnp.stack([
        w,                                          # identity
        jnp.flip(w, axis=1),                        # horizontal (dims=(-1,))
        jnp.flip(w, axis=0),                        # vertical   (dims=(-2,))
        jnp.flip(w, axis=(0, 1)),                   # both       (dims=(-1,-2))
    ]).reshape(4, KIN, STEM_CH)


def _interp_matrix(n_in, n_out):
    """[n_out, n_in] bilinear interpolation matrix, align_corners=True."""
    if n_in == 1:
        return jnp.ones((n_out, 1), jnp.float32)
    s = jnp.arange(n_out, dtype=jnp.float32) * (n_in - 1) / (n_out - 1)
    i0 = jnp.clip(jnp.floor(s).astype(jnp.int32), 0, n_in - 2)
    f = s - i0.astype(jnp.float32)
    return ((1.0 - f)[:, None] * jax.nn.one_hot(i0, n_in, dtype=jnp.float32)
            + f[:, None] * jax.nn.one_hot(i0 + 1, n_in, dtype=jnp.float32))


def _upsample_bilinear_ac(x, scale):
    """[N, h, w, C] -> [N, h*s, w*s, C] via two matmuls (MXU, no gathers)."""
    _, h, w, _ = x.shape
    rmat = _interp_matrix(h, h * scale)
    cmat = _interp_matrix(w, w * scale)
    y = jnp.einsum("Hh,nhwc->nHwc", rmat, x)
    y = jnp.einsum("Ww,nHwc->nHWc", cmat, y)
    return y


def base_forward(params, x0, mean, inv):
    """Surrogate DeepLabV3 head on normalized input: [N,1,H,W] -> [N,3,H,W]."""
    pix, (N, h, w) = _patchify_norm(x0, mean, inv)
    ws = params["w_stem"].astype(jnp.bfloat16)[None]            # [1, 64, 64]
    logits = head_logits_sum(pix, ws, *_prep_head_params(params))
    logits = logits.reshape(N, h, w, OUT_CH)
    up = _upsample_bilinear_ac(logits, UPSAMPLE)
    return jnp.transpose(up, (0, 3, 1, 2))


def tta_forward(params, x0, mean, inv):
    """Matches SmpNet.tta (flip / run / un-flip / mean over dim 0) exactly for
    this head: un-flip(base(flip(x))) == head(pix; flipped stem kernel), and
    the (linear) upsample commutes with the mean, so the 4 variants are summed
    inside the kernel and the (4*N)-mean + a single upsample run on the tiny
    low-res logits."""
    pix, (N, h, w) = _patchify_norm(x0, mean, inv)
    ws = _stem_flip_variants(params["w_stem"]).astype(jnp.bfloat16)  # [4,64,64]
    logits_sum = head_logits_sum(pix, ws, *_prep_head_params(params))
    logits_sum = logits_sum.reshape(N, h, w, OUT_CH)
    avg = jnp.mean(logits_sum, axis=0)[None] * 0.25              # [1, h, w, 3]
    up = _upsample_bilinear_ac(avg, UPSAMPLE)                    # [1, H, W, 3]
    return jnp.transpose(up, (0, 3, 1, 2))                       # [1, 3, H, W]


def smpnet_forward(params, x, training=False):
    """x: [N, C, H, W] float32 NCHW (like PyTorch).  H, W multiples of 8."""
    x0 = x[:, :1]                                  # x = x[:, :1]
    mean, inv = global_stats(x0)                   # whole-tensor mean / std
    if training:
        return base_forward(params, x0, mean, inv)
    return tta_forward(params, x0, mean, inv)


if __name__ == "__main__":
    x = jax.random.normal(jax.random.PRNGKey(0), (2, 4, 16, 16), dtype=jnp.float32)
    params = init_params(jax.random.PRNGKey(42))

    fwd_eval = jax.jit(lambda p, xx: smpnet_forward(p, xx, training=False))
    fwd_train = jax.jit(lambda p, xx: smpnet_forward(p, xx, training=True))

    out = jax.block_until_ready(fwd_eval(params, x))          # eval path (TTA)
    assert out.shape == (1, 3, 16, 16), out.shape
    assert bool(jnp.all(jnp.isfinite(out)))

    out_train = jax.block_until_ready(fwd_train(params, x))   # training path
    assert out_train.shape == (2, 3, 16, 16), out_train.shape
    assert bool(jnp.all(jnp.isfinite(out_train)))

    print("KERNEL_OK")
</pallas_src>

<mosaic_0001>
module attributes {stable_mosaic.version = 11 : i64} {
  func.func @stats_kernel(%arg0: i32, %arg1: i32, %arg2: memref<16x16xf32, #tpu.memory_space<vmem>>, %arg3: memref<8x16xf32, #tpu.memory_space<vmem>>, %arg4: memref<8x16xf32, #tpu.memory_space<vmem>>) attributes {dimension_semantics = [#tpu.dimension_semantics<parallel>, #tpu.dimension_semantics<arbitrary>], iteration_bounds = array<i64: 2, 1>, scalar_prefetch = 0 : i64, scratch_operands = 0 : i64, tpu.core_type = #tpu.core_type<tc>, window_params = [{transform_indices = @transform_0, window_bounds = array<i64: 16, 16>}, {transform_indices = @transform_1, window_bounds = array<i64: 8, 16>}, {transform_indices = @transform_2, window_bounds = array<i64: 8, 16>}]} {
    %c0_i32 = arith.constant 0 : i32
    %0 = arith.cmpi eq, %arg1, %c0_i32 : i32
    %1 = arith.extui %0 : i1 to i32
    %c0_i32_0 = arith.constant 0 : i32
    %2 = arith.cmpi ne, %1, %c0_i32_0 : i32
    scf.if %2 {
      %cst_11 = arith.constant 0.000000e+00 : f32
      %14 = vector.broadcast %cst_11 : f32 to vector<8x16xf32>
      %c0_12 = arith.constant 0 : index
      %c0_13 = arith.constant 0 : index
      %15 = vector.load %arg3[%c0_12, %c0_13] : memref<8x16xf32, #tpu.memory_space<vmem>>, vector<8x16xf32>
      tpu.vector_store %arg3[%c0_12, %c0_13], %14 {strides = array<i32>} : memref<8x16xf32, #tpu.memory_space<vmem>>, vector<8x16xf32>,
      %cst_14 = arith.constant 0.000000e+00 : f32
      %16 = vector.broadcast %cst_14 : f32 to vector<8x16xf32>
      %c0_15 = arith.constant 0 : index
      %c0_16 = arith.constant 0 : index
      %17 = vector.load %arg4[%c0_15, %c0_16] : memref<8x16xf32, #tpu.memory_space<vmem>>, vector<8x16xf32>
      tpu.vector_store %arg4[%c0_15, %c0_16], %16 {strides = array<i32>} : memref<8x16xf32, #tpu.memory_space<vmem>>, vector<8x16xf32>,
    } else {
    }
    %c0 = arith.constant 0 : index
    %c0_1 = arith.constant 0 : index
    %3 = vector.load %arg2[%c0, %c0_1] : memref<16x16xf32, #tpu.memory_space<vmem>>, vector<16x16xf32>
    %4 = vector.shape_cast %3 : vector<16x16xf32> to vector<2x8x16xf32>
    %c0_2 = arith.constant 0 : index
    %c0_3 = arith.constant 0 : index
    %5 = vector.load %arg3[%c0_2, %c0_3] : memref<8x16xf32, #tpu.memory_space<vmem>>, vector<8x16xf32>
    %cst = arith.constant dense<0.000000e+00> : vector<8x16xf32>
    %6 = vector.multi_reduction <add>, %4, %cst [0] : vector<2x8x16xf32> to vector<8x16xf32>
    %7 = arith.addf %5, %6 : vector<8x16xf32>
    %c0_4 = arith.constant 0 : index
    %c0_5 = arith.constant 0 : index
    %8 = vector.load %arg3[%c0_4, %c0_5] : memref<8x16xf32, #tpu.memory_space<vmem>>, vector<8x16xf32>
    tpu.vector_store %arg3[%c0_4, %c0_5], %7 {strides = array<i32>} : memref<8x16xf32, #tpu.memory_space<vmem>>, vector<8x16xf32>,
    %c0_6 = arith.constant 0 : index
    %c0_7 = arith.constant 0 : index
    %9 = vector.load %arg4[%c0_6, %c0_7] : memref<8x16xf32, #tpu.memory_space<vmem>>, vector<8x16xf32>
    %10 = arith.mulf %4, %4 : vector<2x8x16xf32>
    %cst_8 = arith.constant dense<0.000000e+00> : vector<8x16xf32>
    %11 = vector.multi_reduction <add>, %10, %cst_8 [0] : vector<2x8x16xf32> to vector<8x16xf32>
    %12 = arith.addf %9, %11 : vector<8x16xf32>
    %c0_9 = arith.constant 0 : index
    %c0_10 = arith.constant 0 : index
    %13 = vector.load %arg4[%c0_9, %c0_10] : memref<8x16xf32, #tpu.memory_space<vmem>>, vector<8x16xf32>
    tpu.vector_store %arg4[%c0_9, %c0_10], %12 {strides = array<i32>} : memref<8x16xf32, #tpu.memory_space<vmem>>, vector<8x16xf32>,
    return
  }
  func.func @transform_0(%arg0: i32, %arg1: i32) -> (i32, i32) {
    %c1_i32 = arith.constant 1 : i32
    %0 = arith.muli %arg0, %c1_i32 : i32
    %1 = arith.addi %0, %arg1 : i32
    %c0_i32 = arith.constant 0 : i32
    %c0_i32_0 = arith.constant 0 : i32
    return %1, %c0_i32 : i32, i32
  }
  func.func @transform_1(%arg0: i32, %arg1: i32) -> (i32, i32) {
    %c0_i32 = arith.constant 0 : i32
    %c0_i32_0 = arith.constant 0 : i32
    return %arg0, %c0_i32 : i32, i32
  }
  func.func @transform_2(%arg0: i32, %arg1: i32) -> (i32, i32) {
    %c0_i32 = arith.constant 0 : i32
    %c0_i32_0 = arith.constant 0 : i32
    return %arg0, %c0_i32 : i32, i32
  }
}

module attributes {stable_mosaic.version = 11 : i64} {
  func.func @_head_kernel(%arg0: i32, %arg1: memref<8x64xbf16, #tpu.memory_space<vmem>>, %arg2: memref<4x64x64xbf16, #tpu.memory_space<vmem>>, %arg3: memref<1x64xf32, #tpu.memory_space<vmem>>, %arg4: memref<64x128xbf16, #tpu.memory_space<vmem>>, %arg5: memref<1x128xf32, #tpu.memory_space<vmem>>, %arg6: memref<128x128xbf16, #tpu.memory_space<vmem>>, %arg7: memref<1x128xf32, #tpu.memory_space<vmem>>, %arg8: memref<8x128xbf16, #tpu.memory_space<vmem>>) attributes {dimension_semantics = [#tpu.dimension_semantics<parallel>], iteration_bounds = array<i64: 1>, scalar_prefetch = 0 : i64, scratch_operands = 0 : i64, tpu.core_type = #tpu.core_type<tc>, window_params = [{transform_indices = @transform_0, window_bounds = array<i64: 8, 64>}, {pipeline_mode = #tpu.pipeline_mode<synchronous>, transform_indices = @transform_1, window_bounds = array<i64: 4, 64, 64>}, {pipeline_mode = #tpu.pipeline_mode<synchronous>, transform_indices = @transform_2, window_bounds = array<i64: 1, 64>}, {pipeline_mode = #tpu.pipeline_mode<synchronous>, transform_indices = @transform_3, window_bounds = array<i64: 64, 128>}, {pipeline_mode = #tpu.pipeline_mode<synchronous>, transform_indices = @transform_4, window_bounds = array<i64: 1, 128>}, {pipeline_mode = #tpu.pipeline_mode<synchronous>, transform_indices = @transform_5, window_bounds = array<i64: 128, 128>}, {pipeline_mode = #tpu.pipeline_mode<synchronous>, transform_indices = @transform_6, window_bounds = array<i64: 1, 128>}, {transform_indices = @transform_7, window_bounds = array<i64: 8, 128>}]} {
    %c0 = arith.constant 0 : index
    %c0_0 = arith.constant 0 : index
    %0 = vector.load %arg1[%c0, %c0_0] : memref<8x64xbf16, #tpu.memory_space<vmem>>, vector<8x64xbf16>
    %cst = arith.constant 0.000000e+00 : f32
    %1 = vector.broadcast %cst : f32 to vector<8x128xf32>
    %c0_1 = arith.constant 0 : index
    %c0_2 = arith.constant 0 : index
    %c0_3 = arith.constant 0 : index
    %2 = vector.load %arg2[%c0_1, %c0_2, %c0_3] : memref<4x64x64xbf16, #tpu.memory_space<vmem>>, vector<1x64x64xbf16>
    %3 = vector.shape_cast %2 : vector<1x64x64xbf16> to vector<64x64xbf16>
    %cst_4 = arith.constant dense<0.000000e+00> : vector<8x64xf32>
    %4 = tpu.matmul %0, %3, %cst_4 {dimension_numbers = #tpu.dot_dimension_numbers<[1], [0], [0], [1], [0, 0, 1, 1], [], []>} : vector<8x64xbf16>, vector<64x64xbf16>, vector<8x64xf32> -> vector<8x64xf32>
    %c0_5 = arith.constant 0 : index
    %c0_6 = arith.constant 0 : index
    %5 = vector.load %arg3[%c0_5, %c0_6] : memref<1x64xf32, #tpu.memory_space<vmem>>, vector<1x64xf32>
    %6 = vector.broadcast %5 : vector<1x64xf32> to vector<8x64xf32>
    %7 = arith.addf %4, %6 : vector<8x64xf32>
    %cst_7 = arith.constant 0.000000e+00 : f32
    %8 = vector.broadcast %cst_7 : f32 to vector<8x64xf32>
    %9 = arith.maximumf %7, %8 : vector<8x64xf32>
    %10 = arith.truncf %9 : vector<8x64xf32> to vector<8x64xbf16>
    %c0_8 = arith.constant 0 : index
    %c0_9 = arith.constant 0 : index
    %11 = vector.load %arg4[%c0_8, %c0_9] : memref<64x128xbf16, #tpu.memory_space<vmem>>, vector<64x128xbf16>
    %cst_10 = arith.constant dense<0.000000e+00> : vector<8x128xf32>
    %12 = tpu.matmul %10, %11, %cst_10 {dimension_numbers = #tpu.dot_dimension_numbers<[1], [0], [0], [1], [0, 0, 1, 1], [], []>} : vector<8x64xbf16>, vector<64x128xbf16>, vector<8x128xf32> -> vector<8x128xf32>
    %c0_11 = arith.constant 0 : index
    %c0_12 = arith.constant 0 : index
    %13 = vector.load %arg5[%c0_11, %c0_12] : memref<1x128xf32, #tpu.memory_space<vmem>>, vector<1x128xf32>
    %14 = vector.broadcast %13 : vector<1x128xf32> to vector<8x128xf32>
    %15 = arith.addf %12, %14 : vector<8x128xf32>
    %cst_13 = arith.constant 0.000000e+00 : f32
    %16 = vector.broadcast %cst_13 : f32 to vector<8x128xf32>
    %17 = arith.maximumf %15, %16 : vector<8x128xf32>
    %18 = arith.truncf %17 : vector<8x128xf32> to vector<8x128xbf16>
    %c0_14 = arith.constant 0 : index
    %c0_15 = arith.constant 0 : index
    %19 = vector.load %arg6[%c0_14, %c0_15] : memref<128x128xbf16, #tpu.memory_space<vmem>>, vector<128x128xbf16>
    %cst_16 = arith.constant dense<0.000000e+00> : vector<8x128xf32>
    %20 = tpu.matmul %18, %19, %cst_16 {dimension_numbers = #tpu.dot_dimension_numbers<[1], [0], [0], [1], [0, 0, 1, 1], [], []>} : vector<8x128xbf16>, vector<128x128xbf16>, vector<8x128xf32> -> vector<8x128xf32>
    %21 = arith.addf %1, %20 : vector<8x128xf32>
    %c1 = arith.constant 1 : index
    %c0_17 = arith.constant 0 : index
    %c0_18 = arith.constant 0 : index
    %22 = vector.load %arg2[%c1, %c0_17, %c0_18] : memref<4x64x64xbf16, #tpu.memory_space<vmem>>, vector<1x64x64xbf16>
    %23 = vector.shape_cast %22 : vector<1x64x64xbf16> to vector<64x64xbf16>
    %cst_19 = arith.constant dense<0.000000e+00> : vector<8x64xf32>
    %24 = tpu.matmul %0, %23, %cst_19 {dimension_numbers = #tpu.dot_dimension_numbers<[1], [0], [0], [1], [0, 0, 1, 1], [], []>} : vector<8x64xbf16>, vector<64x64xbf16>, vector<8x64xf32> -> vector<8x64xf32>
    %c0_20 = arith.constant 0 : index
    %c0_21 = arith.constant 0 : index
    %25 = vector.load %arg3[%c0_20, %c0_21] : memref<1x64xf32, #tpu.memory_space<vmem>>, vector<1x64xf32>
    %26 = vector.broadcast %25 : vector<1x64xf32> to vector<8x64xf32>
    %27 = arith.addf %24, %26 : vector<8x64xf32>
    %cst_22 = arith.constant 0.000000e+00 : f32
    %28 = vector.broadcast %cst_22 : f32 to vector<8x64xf32>
    %29 = arith.maximumf %27, %28 : vector<8x64xf32>
    %30 = arith.truncf %29 : vector<8x64xf32> to vector<8x64xbf16>
    %c0_23 = arith.constant 0 : index
    %c0_24 = arith.constant 0 : index
    %31 = vector.load %arg4[%c0_23, %c0_24] : memref<64x128xbf16, #tpu.memory_space<vmem>>, vector<64x128xbf16>
    %cst_25 = arith.constant dense<0.000000e+00> : vector<8x128xf32>
    %32 = tpu.matmul %30, %31, %cst_25 {dimension_numbers = #tpu.dot_dimension_numbers<[1], [0], [0], [1], [0, 0, 1, 1], [], []>} : vector<8x64xbf16>, vector<64x128xbf16>, vector<8x128xf32> -> vector<8x128xf32>
    %c0_26 = arith.constant 0 : index
    %c0_27 = arith.constant 0 : index
    %33 = vector.load %arg5[%c0_26, %c0_27] : memref<1x128xf32, #tpu.memory_space<vmem>>, vector<1x128xf32>
    %34 = vector.broadcast %33 : vector<1x128xf32> to vector<8x128xf32>
    %35 = arith.addf %32, %34 : vector<8x128xf32>
    %cst_28 = arith.constant 0.000000e+00 : f32
    %36 = vector.broadcast %cst_28 : f32 to vector<8x128xf32>
    %37 = arith.maximumf %35, %36 : vector<8x128xf32>
    %38 = arith.truncf %37 : vector<8x128xf32> to vector<8x128xbf16>
    %c0_29 = arith.constant 0 : index
    %c0_30 = arith.constant 0 : index
    %39 = vector.load %arg6[%c0_29, %c0_30] : memref<128x128xbf16, #tpu.memory_space<vmem>>, vector<128x128xbf16>
    %cst_31 = arith.constant dense<0.000000e+00> : vector<8x128xf32>
    %40 = tpu.matmul %38, %39, %cst_31 {dimension_numbers = #tpu.dot_dimension_numbers<[1], [0], [0], [1], [0, 0, 1, 1], [], []>} : vector<8x128xbf16>, vector<128x128xbf16>, vector<8x128xf32> -> vector<8x128xf32>
    %41 = arith.addf %21, %40 : vector<8x128xf32>
    %c2 = arith.constant 2 : index
    %c0_32 = arith.constant 0 : index
    %c0_33 = arith.constant 0 : index
    %42 = vector.load %arg2[%c2, %c0_32, %c0_33] : memref<4x64x64xbf16, #tpu.memory_space<vmem>>, vector<1x64x64xbf16>
    %43 = vector.shape_cast %42 : vector<1x64x64xbf16> to vector<64x64xbf16>
    %cst_34 = arith.constant dense<0.000000e+00> : vector<8x64xf32>
    %44 = tpu.matmul %0, %43, %cst_34 {dimension_numbers = #tpu.dot_dimension_numbers<[1], [0], [0], [1], [0, 0, 1, 1], [], []>} : vector<8x64xbf16>, vector<64x64xbf16>, vector<8x64xf32> -> vector<8x64xf32>
    %c0_35 = arith.constant 0 : index
    %c0_36 = arith.constant 0 : index
    %45 = vector.load %arg3[%c0_35, %c0_36] : memref<1x64xf32, #tpu.memory_space<vmem>>, vector<1x64xf32>
    %46 = vector.broadcast %45 : vector<1x64xf32> to vector<8x64xf32>
    %47 = arith.addf %44, %46 : vector<8x64xf32>
    %cst_37 = arith.constant 0.000000e+00 : f32
    %48 = vector.broadcast %cst_37 : f32 to vector<8x64xf32>
    %49 = arith.maximumf %47, %48 : vector<8x64xf32>
    %50 = arith.truncf %49 : vector<8x64xf32> to vector<8x64xbf16>
    %c0_38 = arith.constant 0 : index
    %c0_39 = arith.constant 0 : index
    %51 = vector.load %arg4[%c0_38, %c0_39] : memref<64x128xbf16, #tpu.memory_space<vmem>>, vector<64x128xbf16>
    %cst_40 = arith.constant dense<0.000000e+00> : vector<8x128xf32>
    %52 = tpu.matmul %50, %51, %cst_40 {dimension_numbers = #tpu.dot_dimension_numbers<[1], [0], [0], [1], [0, 0, 1, 1], [], []>} : vector<8x64xbf16>, vector<64x128xbf16>, vector<8x128xf32> -> vector<8x128xf32>
    %c0_41 = arith.constant 0 : index
    %c0_42 = arith.constant 0 : index
    %53 = vector.load %arg5[%c0_41, %c0_42] : memref<1x128xf32, #tpu.memory_space<vmem>>, vector<1x128xf32>
    %54 = vector.broadcast %53 : vector<1x128xf32> to vector<8x128xf32>
    %55 = arith.addf %52, %54 : vector<8x128xf32>
    %cst_43 = arith.constant 0.000000e+00 : f32
    %56 = vector.broadcast %cst_43 : f32 to vector<8x128xf32>
    %57 = arith.maximumf %55, %56 : vector<8x128xf32>
    %58 = arith.truncf %57 : vector<8x128xf32> to vector<8x128xbf16>
    %c0_44 = arith.constant 0 : index
    %c0_45 = arith.constant 0 : index
    %59 = vector.load %arg6[%c0_44, %c0_45] : memref<128x128xbf16, #tpu.memory_space<vmem>>, vector<128x128xbf16>
    %cst_46 = arith.constant dense<0.000000e+00> : vector<8x128xf32>
    %60 = tpu.matmul %58, %59, %cst_46 {dimension_numbers = #tpu.dot_dimension_numbers<[1], [0], [0], [1], [0, 0, 1, 1], [], []>} : vector<8x128xbf16>, vector<128x128xbf16>, vector<8x128xf32> -> vector<8x128xf32>
    %61 = arith.addf %41, %60 : vector<8x128xf32>
    %c3 = arith.constant 3 : index
    %c0_47 = arith.constant 0 : index
    %c0_48 = arith.constant 0 : index
    %62 = vector.load %arg2[%c3, %c0_47, %c0_48] : memref<4x64x64xbf16, #tpu.memory_space<vmem>>, vector<1x64x64xbf16>
    %63 = vector.shape_cast %62 : vector<1x64x64xbf16> to vector<64x64xbf16>
    %cst_49 = arith.constant dense<0.000000e+00> : vector<8x64xf32>
    %64 = tpu.matmul %0, %63, %cst_49 {dimension_numbers = #tpu.dot_dimension_numbers<[1], [0], [0], [1], [0, 0, 1, 1], [], []>} : vector<8x64xbf16>, vector<64x64xbf16>, vector<8x64xf32> -> vector<8x64xf32>
    %c0_50 = arith.constant 0 : index
    %c0_51 = arith.constant 0 : index
    %65 = vector.load %arg3[%c0_50, %c0_51] : memref<1x64xf32, #tpu.memory_space<vmem>>, vector<1x64xf32>
    %66 = vector.broadcast %65 : vector<1x64xf32> to vector<8x64xf32>
    %67 = arith.addf %64, %66 : vector<8x64xf32>
    %cst_52 = arith.constant 0.000000e+00 : f32
    %68 = vector.broadcast %cst_52 : f32 to vector<8x64xf32>
    %69 = arith.maximumf %67, %68 : vector<8x64xf32>
    %70 = arith.truncf %69 : vector<8x64xf32> to vector<8x64xbf16>
    %c0_53 = arith.constant 0 : index
    %c0_54 = arith.constant 0 : index
    %71 = vector.load %arg4[%c0_53, %c0_54] : memref<64x128xbf16, #tpu.memory_space<vmem>>, vector<64x128xbf16>
    %cst_55 = arith.constant dense<0.000000e+00> : vector<8x128xf32>
    %72 = tpu.matmul %70, %71, %cst_55 {dimension_numbers = #tpu.dot_dimension_numbers<[1], [0], [0], [1], [0, 0, 1, 1], [], []>} : vector<8x64xbf16>, vector<64x128xbf16>, vector<8x128xf32> -> vector<8x128xf32>
    %c0_56 = arith.constant 0 : index
    %c0_57 = arith.constant 0 : index
    %73 = vector.load %arg5[%c0_56, %c0_57] : memref<1x128xf32, #tpu.memory_space<vmem>>, vector<1x128xf32>
    %74 = vector.broadcast %73 : vector<1x128xf32> to vector<8x128xf32>
    %75 = arith.addf %72, %74 : vector<8x128xf32>
    %cst_58 = arith.constant 0.000000e+00 : f32
    %76 = vector.broadcast %cst_58 : f32 to vector<8x128xf32>
    %77 = arith.maximumf %75, %76 : vector<8x128xf32>
    %78 = arith.truncf %77 : vector<8x128xf32> to vector<8x128xbf16>
    %c0_59 = arith.constant 0 : index
    %c0_60 = arith.constant 0 : index
    %79 = vector.load %arg6[%c0_59, %c0_60] : memref<128x128xbf16, #tpu.memory_space<vmem>>, vector<128x128xbf16>
    %cst_61 = arith.constant dense<0.000000e+00> : vector<8x128xf32>
    %80 = tpu.matmul %78, %79, %cst_61 {dimension_numbers = #tpu.dot_dimension_numbers<[1], [0], [0], [1], [0, 0, 1, 1], [], []>} : vector<8x128xbf16>, vector<128x128xbf16>, vector<8x128xf32> -> vector<8x128xf32>
    %81 = arith.addf %61, %80 : vector<8x128xf32>
    %c0_62 = arith.constant 0 : index
    %c0_63 = arith.constant 0 : index
    %82 = vector.load %arg7[%c0_62, %c0_63] : memref<1x128xf32, #tpu.memory_space<vmem>>, vector<1x128xf32>
    %cst_64 = arith.constant 4.000000e+00 : f32
    %83 = vector.broadcast %cst_64 : f32 to vector<1x128xf32>
    %84 = arith.mulf %83, %82 : vector<1x128xf32>
    %85 = vector.broadcast %84 : vector<1x128xf32> to vector<8x128xf32>
    %86 = arith.addf %81, %85 : vector<8x128xf32>
    %87 = arith.truncf %86 : vector<8x128xf32> to vector<8x128xbf16>
    %c0_65 = arith.constant 0 : index
    %c0_66 = arith.constant 0 : index
    %88 = vector.load %arg8[%c0_65, %c0_66] : memref<8x128xbf16, #tpu.memory_space<vmem>>, vector<8x128xbf16>
    tpu.vector_store %arg8[%c0_65, %c0_66], %87 {strides = array<i32>} : memref<8x128xbf16, #tpu.memory_space<vmem>>, vector<8x128xbf16>,
    return
  }
  func.func @transform_0(%arg0: i32) -> (i32, i32) {
    %c0_i32 = arith.constant 0 : i32
    %c0_i32_0 = arith.constant 0 : i32
    return %arg0, %c0_i32 : i32, i32
  }
  func.func @transform_1(%arg0: i32) -> (i32, i32, i32) {
    %c0_i32 = arith.constant 0 : i32
    %c0_i32_0 = arith.constant 0 : i32
    %c0_i32_1 = arith.constant 0 : i32
    %c0_i32_2 = arith.constant 0 : i32
    return %c0_i32, %c0_i32_0, %c0_i32_1 : i32, i32, i32
  }
  func.func @transform_2(%arg0: i32) -> (i32, i32) {
    %c0_i32 = arith.constant 0 : i32
    %c0_i32_0 = arith.constant 0 : i32
    %c0_i32_1 = arith.constant 0 : i32
    return %c0_i32, %c0_i32_0 : i32, i32
  }
  func.func @transform_3(%arg0: i32) -> (i32, i32) {
    %c0_i32 = arith.constant 0 : i32
    %c0_i32_0 = arith.constant 0 : i32
    %c0_i32_1 = arith.constant 0 : i32
    return %c0_i32, %c0_i32_0 : i32, i32
  }
  func.func @transform_4(%arg0: i32) -> (i32, i32) {
    %c0_i32 = arith.constant 0 : i32
    %c0_i32_0 = arith.constant 0 : i32
    %c0_i32_1 = arith.constant 0 : i32
    return %c0_i32, %c0_i32_0 : i32, i32
  }
  func.func @transform_5(%arg0: i32) -> (i32, i32) {
    %c0_i32 = arith.constant 0 : i32
    %c0_i32_0 = arith.constant 0 : i32
    %c0_i32_1 = arith.constant 0 : i32
    return %c0_i32, %c0_i32_0 : i32, i32
  }
  func.func @transform_6(%arg0: i32) -> (i32, i32) {
    %c0_i32 = arith.constant 0 : i32
    %c0_i32_0 = arith.constant 0 : i32
    %c0_i32_1 = arith.constant 0 : i32
    return %c0_i32, %c0_i32_0 : i32, i32
  }
  func.func @transform_7(%arg0: i32) -> (i32, i32) {
    %c0_i32 = arith.constant 0 : i32
    %c0_i32_0 = arith.constant 0 : i32
    return %arg0, %c0_i32 : i32, i32
  }
}

</mosaic_0001>

<bundles_post_ra>
// kernel: _lambda_.2
= control target key start
LH: loop header
LB: loop body
LE: loop exit
PB: predicated region body
PF: predicated region fallthrough
CT: control target
= control target key end

     0   :  { %s366_s9 = smov 0   ;;  %s368_s10 = smov 0   ;;  %s410_s0 = inlined_call_operand.vmem [shape: f32[32,16], index: 0, kind: input, shape index: {}]   ;;  %s411_s1 = inlined_call_operand.vmem [shape: f32[16,16], index: 1, kind: output, shape index: {0}]   ;;  %s412_s2 = inlined_call_operand.vmem [shape: f32[16,16], index: 2, kind: output, shape index: {1}]  }
   0x1   :  { %s370_s11 = smov 0  }
   0x2 LB: > { %s25_s12 = sadd.s32 1, %s344_s10  ;;  %p294_p0 = scmp.ge.s32.totalorder %s348_s11, 1  ;;  %s348_s11 = sphi %s370_s11, %s13_s11   ;;  %s344_s10 = sphi %s368_s10, %s414_s10   ;;  %s340_s9 = sphi %s366_s9, %s413_s9  }
   0x3   : > { %p27_p1 = scmp.ge.s32.totalorder %s25_s12, 2  ;;  %p132_p2 = scmp.lt.s32.totalorder %s348_s11, 3 }
   0x5   : > { %s416_s12 = smov (%p27_p1, %s25_s12), 0  ;;  %p133_p3 = pnand %p294_p0, %p132_p2 }
   0x6   : > { %s295_s13 = sshll.u32 (!%p133_p3), %s340_s9, 1  ;;  %p166_p4 = scmp.lt.s32.totalorder (!%p133_p3), %s340_s9, 1  ;;  %vm178_vm0 = vcmask (!%p133_p3), 130048   ;;  %v350_v0 = vmov (!%p133_p3), 0.0  }
   0x7   : > { %136 = sbr.rel (%p133_p3) target bundleno = 29 (0x1d), region = 24  ;;  %p160_p5 = scmp.lt.s32.totalorder (!%p133_p3), %s295_s13, 3 }
   0xe   : > { %s418_s9 = smov (!%p166_p4, %s340_s9), 1  ;;  %s420_s13 = smov (!%p160_p5, %s295_s13), 3 }
   0xf   : > { %s297_s14 = sshll.u32 %s418_s9, 3  ;;  %s296_s15 = sshll.u32 %s420_s13, 3 }
  0x10   : > { %s169_s18 = scalar_lea.vmem %s411_s1, %s297_s14  ;;  %s163_s21 = scalar_lea.vmem %s410_s0, %s296_s15 }
  0x11   : > { %179 = vst.msk [vmem:[%s169_s18] sm:$0xff] %vm178_vm0, %v350_v0  ;;  %s173_s24 = scalar_lea.vmem %s412_s2, %s297_s14  ;;  %v181_v1 = vld [vmem:[%s163_s21] sm:$0xff]  ;;  %v182_v2 = vld [vmem:[%s163_s21 + $0x8] sm:$0xff] }
  0x12   : > { %180 = vst.msk [vmem:[%s173_s24] sm:$0xff] %vm178_vm0, %v350_v0  ;;  %v185_v3 = vsel %vm178_vm0, %v181_v1, 0.0  ;;  %v186_v4 = vsel %vm178_vm0, %v182_v2, 0.0  ;;  %v191_v5 = vmul.f32 %v181_v1, %v181_v1  ;;  %v192_v6 = vmul.f32 %v182_v2, %v182_v2 }
  0x13   : > { %v187_v7 = vadd.f32 %v186_v4, %v185_v3 }
  0x14   : > { %v193_v8 = vsel %vm178_vm0, %v191_v5, 0.0  ;;  %v194_v9 = vsel %vm178_vm0, %v192_v6, 0.0 }
  0x15   : > { %v195_v10 = vadd.f32 %v194_v9, %v193_v8 }
  0x18   : > { %v183_v11 = vld [vmem:[%s169_s18] sm:$0xff] }
  0x19   : > { %v188_v12 = vadd.f32 %v187_v7, %v183_v11  ;;  %v190_v13 = vld [vmem:[%s173_s24] sm:$0xff] }
  0x1a   : > { %v196_v14 = vadd.f32 %v195_v10, %v190_v13 }
  0x1b   : > { %189 = vst.msk [vmem:[%s169_s18] sm:$0xff] %vm178_vm0, %v188_v12 }
  0x1c   : > { %197 = vst.msk [vmem:[%s173_s24] sm:$0xff] %vm178_vm0, %v196_v14 }
  0x1d PF: > { %s13_s11 = sadd.s32 1, %s348_s11   ;;  %s413_s9 = smov %s344_s10 }
  0x1e   : > { %p10_p6 = scmp.ge.s32.totalorder %s13_s11, 4   ;;  %s414_s10 = smov %s416_s12 }
  0x20   :  { %12 = sbr.rel (!%p10_p6) target bundleno = 2 (0x2), region = 70 }

// kernel: _lambda_.3
= control target key start
LH: loop header
LB: loop body
LE: loop exit
PB: predicated region body
PF: predicated region fallthrough
CT: control target
= control target key end

     0   :  { %v1142_v0 = vmov 0.0   ;;  %vm1143_vm0 = vmmov 0   ;;  %vm67_vm1 = vcmask 523264   ;;  %s1472_s1 = inlined_call_operand.vmem [shape: bf16[4,64,64], index: 1, kind: input, shape index: {}]   ;;  %s1473_s3 = inlined_call_operand.vmem [shape: bf16[64,128], index: 3, kind: input, shape index: {}]   ;;  %s1474_s0 = inlined_call_operand.vmem [shape: bf16[8,64], index: 0, kind: input, shape index: {}]   ;;  %s1475_s5 = inlined_call_operand.vmem [shape: bf16[128,128], index: 5, kind: input, shape index: {}]   ;;  %s1476_s2 = inlined_call_operand.vmem [shape: f32[1,64], index: 2, kind: input, shape index: {}]   ;;  %s1477_s4 = inlined_call_operand.vmem [shape: f32[1,128], index: 4, kind: input, shape index: {}]   ;;  %s1478_s6 = inlined_call_operand.vmem [shape: f32[1,128], index: 6, kind: input, shape index: {}]   ;;  %s1479_s7 = inlined_call_operand.vmem [shape: bf16[8,128], index: 7, kind: output, shape index: {}]  }
   0x1   :  { %936 = vmatprep.subr.bf16.mxu1 %v1142_v0  ;;  %v1114_v1 = vld [vmem:[%s1472_s1] sm:$0xff]   ;;  %960 = vmatprep.subr.bf16.mxu0 %v1142_v0  ;;  %v1115_v2 = vld [vmem:[%s1472_s1 + $0x8] sm:$0xff]   ;;  %v1116_v4 = vld [vmem:[%s1472_s1 + $0x10] sm:$0xff]  }
   0x2   :  { %944 = vmatprep.mubr.msk.bf16.mxu1 %vm1143_vm0, %v1142_v0  ;;  %968 = vmatprep.mubr.msk.bf16.mxu0 %vm1143_vm0, %v1142_v0  ;;  %v1118_v3 = vld [vmem:[%s1472_s1 + $0x20] sm:$0xff]   ;;  %v1119_v5 = vld [vmem:[%s1472_s1 + $0x28] sm:$0xff]   ;;  %v1117_v6 = vld [vmem:[%s1472_s1 + $0x18] sm:$0xff]  }
   0x3   :  { %937 = vmatpush3.bf16.msra.mxu1 %v1114_v1  ;;  %961 = vmatpush3.bf16.msra.mxu0 %v1118_v3  ;;  %v1120_v7 = vld [vmem:[%s1472_s1 + $0x30] sm:$0xff]   ;;  %v1219_v8 = vld [vmem:[%s1474_s0] sm:$0xf]  ;;  %v1121_v9 = vld [vmem:[%s1472_s1 + $0x38] sm:$0xff]  }
   0x4   :  { %938 = vmatprep.subr.bf16.mxu1 %v1142_v0  ;;  %962 = vmatprep.subr.bf16.mxu0 %v1142_v0  ;;  %v1227_v10 = vld [vmem:[%s1473_s3] sm:$0xff]   ;;  %v1237_v11 = vld [vmem:[%s1473_s3 + $0x8] sm:$0xff]   ;;  %v1249_v12 = vld [vmem:[%s1473_s3 + $0x10] sm:$0xff]  }
   0x5   :  { %v1259_v13 = vld [vmem:[%s1473_s3 + $0x18] sm:$0xff]   ;;  %v1266_v14 = vld [vmem:[%s1475_s5] sm:$0xff]   ;;  %v1271_v15 = vld [vmem:[%s1475_s5 + $0x8] sm:$0xff]  }
   0x6   :  { %v1280_v16 = vld [vmem:[%s1475_s5 + $0x10] sm:$0xff]   ;;  %v1287_v17 = vld [vmem:[%s1475_s5 + $0x18] sm:$0xff]   ;;  %v1294_v18 = vld [vmem:[%s1475_s5 + $0x20] sm:$0xff]  }
   0x7   :  { %939 = vmatpush3.bf16.msra.mxu1 %v1115_v2  ;;  %963 = vmatpush3.bf16.msra.mxu0 %v1119_v5  ;;  %v1301_v19 = vld [vmem:[%s1475_s5 + $0x28] sm:$0xff]   ;;  %v1308_v20 = vld [vmem:[%s1476_s2] ss:$0 sm:$0xff]  ;;  %v1341_v35 = vld [vmem:[%s1475_s5 + $0x30] sm:$0xff]  }
   0x8   :  { %940 = vmatprep.subr.bf16.mxu1 %v1142_v0  ;;  %964 = vmatprep.subr.bf16.mxu0 %v1142_v0  ;;  %v1350_v36 = vld [vmem:[%s1475_s5 + $0x38] sm:$0xff]   ;;  %v1359_v37 = vld [vmem:[%s1477_s4] ss:$0 sm:$0xff]  ;;  %v1135_v53 = vld [vmem:[%s1472_s1 + $0x48] sm:$0xff]  }
   0x9   :  { %v1134_v51 = vld [vmem:[%s1472_s1 + $0x40] sm:$0xff]   ;;  %v1136_v54 = vld [vmem:[%s1472_s1 + $0x50] sm:$0xff]   ;;  %v1137_v55 = vld [vmem:[%s1472_s1 + $0x58] sm:$0xff]  }
   0xb   :  { %941 = vmatpush3.bf16.msra.mxu1 %v1116_v4  ;;  %965 = vmatpush3.bf16.msra.mxu0 %v1120_v7 }
   0xc   :  { %942 = vmatprep.subr.bf16.mxu1 %v1142_v0  ;;  %966 = vmatprep.subr.bf16.mxu0 %v1142_v0 }
   0xf   :  { %943 = vmatpush3.bf16.msra.mxu1 %v1117_v6  ;;  %967 = vmatpush3.bf16.msra.mxu0 %v1121_v9  ;;  %v1138_v9 = vld [vmem:[%s1472_s1 + $0x60] sm:$0xff]  }
  0x10   :  { %948 = vmatprep.subr.bf16.mxu1 %v1142_v0  ;;  %984 = vmatprep.subr.bf16.mxu0 %v1142_v0 }
  0x12   :  { %945 = vmatmul.mubr.msk.bf16.vlgmr.msra.gmra.mrb[0].mxu1 %vm67_vm1, %v1219_v8  ;;  %969 = vmatmul.mubr.msk.bf16.vlgmr.msra.gmra.mrb[0].mxu0 %vm67_vm1, %v1219_v8 }
  0x13   :  { %949 = vmatpush3.bf16.msra.mxu1 %v1227_v10  ;;  %956 = vmatprep.mubr.msk.bf16.mxu1 %vm1143_vm0, %v1142_v0 }
  0x14   :  { %950 = vmatprep.subr.bf16.mxu1 %v1142_v0  ;;  %1000 = vmatprep.mubr.msk.bf16.mxu0 %vm1143_vm0, %v1142_v0 }
  0x15   :  { %985 = vmatpush3.bf16.msra.mxu0 %v1266_v14 }
  0x16   :  { %986 = vmatprep.subr.bf16.mxu0 %v1142_v0 }
  0x17   :  { %951 = vmatpush3.bf16.msra.mxu1 %v1237_v11 }
  0x18   :  { %952 = vmatprep.subr.bf16.mxu1 %v1142_v0 }
  0x19   :  { %987 = vmatpush3.bf16.msra.mxu0 %v1271_v15 }
  0x1a   :  { %988 = vmatprep.subr.bf16.mxu0 %v1142_v0 }
  0x1b   :  { %953 = vmatpush3.bf16.msra.mxu1 %v1249_v12 }
  0x1c   :  { %954 = vmatprep.subr.bf16.mxu1 %v1142_v0 }
  0x1d   :  { %989 = vmatpush3.bf16.msra.mxu0 %v1280_v16 }
  0x1e   :  { %990 = vmatprep.subr.bf16.mxu0 %v1142_v0 }
  0x1f   :  { %955 = vmatpush3.bf16.msra.mxu1 %v1259_v13 }
  0x20   :  { %972 = vmatprep.subr.bf16.mxu1 %v1142_v0 }
  0x21   :  { %991 = vmatpush3.bf16.msra.mxu0 %v1287_v17 }
  0x22   :  { %992 = vmatprep.subr.bf16.mxu0 %v1142_v0 }
  0x25   :  { %993 = vmatpush3.bf16.msra.mxu0 %v1294_v18 }
  0x26   :  { %994 = vmatprep.subr.bf16.mxu0 %v1142_v0 }
  0x29   :  { %995 = vmatpush3.bf16.msra.mxu0 %v1301_v19 }
  0x2a   :  { %996 = vmatprep.subr.bf16.mxu0 %v1142_v0 }
  0x2d   :  { %997 = vmatpush3.bf16.msra.mxu0 %v1341_v35 }
  0x2e   :  { %998 = vmatprep.subr.bf16.mxu0 %v1142_v0 }
  0x31   :  { %999 = vmatpush3.bf16.msra.mxu0 %v1350_v36 }
  0x32   :  { %1024 = vmatprep.subr.bf16.mxu0 %v1142_v0 }
  0xe5   :  { %v105_v21 = vpop.f32.mrb[0].mxu1  ;;  %v280_v27 = vpop.f32.mrb[0].mxu0 }
  0xe6   :  { %v106_v22 = vadd.f32 %v1308_v20, %v105_v21  ;;  %v946_v23 = vpop.f32.mrb[1].mxu1  ;;  %v970_v29 = vpop.f32.mrb[1].mxu0  ;;  %v281_v32 = vadd.f32 %v1308_v20, %v280_v27 }
  0xe7   :  { %v108_v24 = vpop.f32.mrb[2].mxu1  ;;  %v283_v30 = vpop.f32.mrb[2].mxu0  ;;  %v1140_v23 = vld [vmem:[%s1472_s1 + $0x70] sm:$0xff]  }
  0xe8   :  { %v111_v25 = vmax.f32 %v106_v22, 0.0  ;;  %v947_v26 = vpop.f32.mrb[3].mxu1  ;;  %v971_v31 = vpop.f32.mrb[3].mxu0  ;;  %v286_v33 = vmax.f32 %v281_v32, 0.0  ;;  %v1139_v22 = vld [vmem:[%s1472_s1 + $0x68] sm:$0xff]   ;;  %v1141_v24 = vld [vmem:[%s1472_s1 + $0x78] sm:$0xff]  }
  0xea   :  { %v112_v28 = vpack.c.bf16 %v111_v25, %v111_v25  ;;  %v287_v34 = vpack.c.bf16 %v286_v33, %v286_v33 }
  0xec   :  { %957 = vmatmul.mubr.msk.bf16.vlgmr.msra.gmra.mrb[4].mxu1 %vm67_vm1, %v112_v28 }
  0xed   :  { %973 = vmatpush3.bf16.msra.mxu1 %v1227_v10  ;;  %980 = vmatprep.mubr.msk.bf16.mxu1 %vm1143_vm0, %v1142_v0 }
  0xee   :  { %974 = vmatprep.subr.bf16.mxu1 %v1142_v0 }
  0xf1   :  { %975 = vmatpush3.bf16.msra.mxu1 %v1237_v11 }
  0xf2   :  { %976 = vmatprep.subr.bf16.mxu1 %v1142_v0 }
  0xf5   :  { %977 = vmatpush3.bf16.msra.mxu1 %v1249_v12 }
  0xf6   :  { %978 = vmatprep.subr.bf16.mxu1 %v1142_v0 }
  0xf9   :  { %979 = vmatpush3.bf16.msra.mxu1 %v1259_v13 }
  0xfa   :  { %1004 = vmatprep.subr.bf16.mxu1 %v1142_v0 }
  0xfc   :  { %981 = vmatmul.mubr.msk.bf16.vlgmr.msra.gmra.mrb[8].mxu1 %vm67_vm1, %v287_v34 }
  0xfd   :  { %1005 = vmatpush3.bf16.msra.mxu1 %v1266_v14  ;;  %1020 = vmatprep.mubr.msk.bf16.mxu1 %vm1143_vm0, %v1142_v0 }
  0xfe   :  { %1006 = vmatprep.subr.bf16.mxu1 %v1142_v0 }
 0x101   :  { %1007 = vmatpush3.bf16.msra.mxu1 %v1271_v15 }
 0x102   :  { %1008 = vmatprep.subr.bf16.mxu1 %v1142_v0 }
 0x105   :  { %1009 = vmatpush3.bf16.msra.mxu1 %v1280_v16 }
 0x106   :  { %1010 = vmatprep.subr.bf16.mxu1 %v1142_v0 }
 0x109   :  { %1011 = vmatpush3.bf16.msra.mxu1 %v1287_v17 }
 0x10a   :  { %1012 = vmatprep.subr.bf16.mxu1 %v1142_v0 }
 0x10d   :  { %1013 = vmatpush3.bf16.msra.mxu1 %v1294_v18 }
 0x10e   :  { %1014 = vmatprep.subr.bf16.mxu1 %v1142_v0 }
 0x111   :  { %1015 = vmatpush3.bf16.msra.mxu1 %v1301_v19 }
 0x112   :  { %1016 = vmatprep.subr.bf16.mxu1 %v1142_v0 }
 0x115   :  { %1017 = vmatpush3.bf16.msra.mxu1 %v1341_v35 }
 0x116   :  { %1018 = vmatprep.subr.bf16.mxu1 %v1142_v0 }
 0x119   :  { %1019 = vmatpush3.bf16.msra.mxu1 %v1350_v36 }
 0x11a   :  { %1036 = vmatprep.subr.bf16.mxu1 %v1142_v0 }
 0x1bf   :  { %v189_v38 = vpop.f32.mrb[4].mxu1 }
 0x1c0   :  { %v190_v39 = vadd.f32 %v1359_v37, %v189_v38  ;;  %v958_v40 = vpop.f32.mrb[5].mxu1 }
 0x1c1   :  { %v192_v41 = vpop.f32.mrb[6].mxu1 }
 0x1c2   :  { %v195_v42 = vmax.f32 %v190_v39, 0.0  ;;  %v959_v43 = vpop.f32.mrb[7].mxu1 }
 0x1c4   :  { %v196_v44 = vpack.c.bf16 %v195_v42, %v195_v42 }
 0x1c6   :  { %1021 = vmatmul.mubr.bf16.vlgmr.msra.gmra.mrb[12].mxu1 %v196_v44 }
 0x1c7   :  { %1037 = vmatpush3.bf16.msra.mxu1 %v1227_v10  ;;  %1044 = vmatprep.mubr.msk.bf16.mxu1 %vm1143_vm0, %v1142_v0 }
 0x1c8   :  { %1038 = vmatprep.subr.bf16.mxu1 %v1142_v0 }
 0x1cb   :  { %1039 = vmatpush3.bf16.msra.mxu1 %v1237_v11 }
 0x1cc   :  { %1040 = vmatprep.subr.bf16.mxu1 %v1142_v0 }
 0x1cf   :  { %v325_v45 = vpop.f32.mrb[8].mxu1  ;;  %1041 = vmatpush3.bf16.msra.mxu1 %v1249_v12 }
 0x1d0   :  { %v326_v46 = vadd.f32 %v1359_v37, %v325_v45  ;;  %v982_v47 = vpop.f32.mrb[9].mxu1  ;;  %1042 = vmatprep.subr.bf16.mxu1 %v1142_v0 }
 0x1d1   :  { %v328_v48 = vpop.f32.mrb[10].mxu1 }
 0x1d2   :  { %v331_v49 = vmax.f32 %v326_v46, 0.0  ;;  %v983_v50 = vpop.f32.mrb[11].mxu1 }
 0x1d3   :  { %1043 = vmatpush3.bf16.msra.mxu1 %v1259_v13 }
 0x1d4   :  { %v332_v52 = vpack.c.bf16 %v331_v49, %v331_v49  ;;  %1068 = vmatprep.subr.bf16.mxu1 %v1142_v0 }
 0x1d6   :  { %1001 = vmatmul.mubr.bf16.vlgmr.msra.gmra.mrb[4].mxu0 %v332_v52 }
 0x1d7   :  { %1025 = vmatpush3.bf16.msra.mxu0 %v1134_v51  ;;  %1032 = vmatprep.mubr.msk.bf16.mxu0 %vm1143_vm0, %v1142_v0 }
 0x1d8   :  { %1026 = vmatprep.subr.bf16.mxu0 %v1142_v0 }
 0x1db   :  { %1027 = vmatpush3.bf16.msra.mxu0 %v1135_v53 }
 0x1dc   :  { %1028 = vmatprep.subr.bf16.mxu0 %v1142_v0 }
 0x1df   :  { %1029 = vmatpush3.bf16.msra.mxu0 %v1136_v54 }
 0x1e0   :  { %1030 = vmatprep.subr.bf16.mxu0 %v1142_v0 }
 0x1e3   :  { %1031 = vmatpush3.bf16.msra.mxu0 %v1137_v55 }
 0x1e4   :  { %1048 = vmatprep.subr.bf16.mxu0 %v1142_v0 }
 0x1e6   :  { %1033 = vmatmul.mubr.msk.bf16.vlgmr.msra.gmra.mrb[8].mxu0 %vm67_vm1, %v1219_v8 }
 0x1e7   :  { %1049 = vmatpush3.bf16.msra.mxu0 %v1266_v14  ;;  %1064 = vmatprep.mubr.msk.bf16.mxu0 %vm1143_vm0, %v1142_v0 }
 0x1e8   :  { %1050 = vmatprep.subr.bf16.mxu0 %v1142_v0 }
 0x1eb   :  { %1051 = vmatpush3.bf16.msra.mxu0 %v1271_v15 }
 0x1ec   :  { %1052 = vmatprep.subr.bf16.mxu0 %v1142_v0 }
 0x1ef   :  { %1053 = vmatpush3.bf16.msra.mxu0 %v1280_v16 }
 0x1f0   :  { %1054 = vmatprep.subr.bf16.mxu0 %v1142_v0 }
 0x1f3   :  { %1055 = vmatpush3.bf16.msra.mxu0 %v1287_v17 }
 0x1f4   :  { %1056 = vmatprep.subr.bf16.mxu0 %v1142_v0 }
 0x1f7   :  { %1057 = vmatpush3.bf16.msra.mxu0 %v1294_v18 }
 0x1f8   :  { %1058 = vmatprep.subr.bf16.mxu0 %v1142_v0 }
 0x1fb   :  { %1059 = vmatpush3.bf16.msra.mxu0 %v1301_v19 }
 0x1fc   :  { %1060 = vmatprep.subr.bf16.mxu0 %v1142_v0 }
 0x1ff   :  { %1061 = vmatpush3.bf16.msra.mxu0 %v1341_v35 }
 0x200   :  { %1062 = vmatprep.subr.bf16.mxu0 %v1142_v0 }
 0x203   :  { %1063 = vmatpush3.bf16.msra.mxu0 %v1350_v36 }
 0x204   :  { %1092 = vmatprep.subr.bf16.mxu0 %v1142_v0 }
 0x299   :  { %v455_v56 = vpop.f32.mrb[12].mxu1 }
 0x29a   :  { %v1022_v57 = vpop.f32.mrb[13].mxu1 }
 0x29b   :  { %v458_v58 = vpop.f32.mrb[14].mxu1 }
 0x29c   :  { %v1023_v59 = vpop.f32.mrb[15].mxu1 }
 0x2a9   :  { %v415_v60 = vpop.f32.mrb[4].mxu0 }
 0x2aa   :  { %v1411_v61 = vadd.f32 %v455_v56, %v415_v60  ;;  %v1002_v62 = vpop.f32.mrb[5].mxu0 }
 0x2ab   :  { %v418_v63 = vpop.f32.mrb[6].mxu0 }
 0x2ac   :  { %v1003_v1 = vpop.f32.mrb[7].mxu0 }
 0x2b9   :  { %v528_v2 = vpop.f32.mrb[8].mxu0 }
 0x2ba   :  { %v529_v3 = vadd.f32 %v1308_v20, %v528_v2  ;;  %v1034_v4 = vpop.f32.mrb[9].mxu0 }
 0x2bb   :  { %v531_v5 = vpop.f32.mrb[10].mxu0 }
 0x2bc   :  { %v534_v6 = vmax.f32 %v529_v3, 0.0  ;;  %v1035_v7 = vpop.f32.mrb[11].mxu0 }
 0x2be   :  { %v535_v21 = vpack.c.bf16 %v534_v6, %v534_v6 }
 0x2c0   :  { %1045 = vmatmul.mubr.msk.bf16.vlgmr.msra.gmra.mrb[16].mxu1 %vm67_vm1, %v535_v21 }
 0x2c1   :  { %1069 = vmatpush3.bf16.msra.mxu1 %v1138_v9  ;;  %1076 = vmatprep.mubr.msk.bf16.mxu1 %vm1143_vm0, %v1142_v0 }
 0x2c2   :  { %1070 = vmatprep.subr.bf16.mxu1 %v1142_v0 }
 0x2c5   :  { %1071 = vmatpush3.bf16.msra.mxu1 %v1139_v22 }
 0x2c6   :  { %1072 = vmatprep.subr.bf16.mxu1 %v1142_v0 }
 0x2c9   :  { %1073 = vmatpush3.bf16.msra.mxu1 %v1140_v23 }
 0x2ca   :  { %1074 = vmatprep.subr.bf16.mxu1 %v1142_v0 }
 0x2cd   :  { %1075 = vmatpush3.bf16.msra.mxu1 %v1141_v24 }
 0x2ce   :  { %1080 = vmatprep.subr.bf16.mxu1 %v1142_v0 }
 0x2d0   :  { %1077 = vmatmul.mubr.msk.bf16.vlgmr.msra.gmra.mrb[20].mxu1 %vm67_vm1, %v1219_v8 }
 0x2d1   :  { %1081 = vmatpush3.bf16.msra.mxu1 %v1227_v10  ;;  %1088 = vmatprep.mubr.msk.bf16.mxu1 %vm1143_vm0, %v1142_v0 }
 0x2d2   :  { %1082 = vmatprep.subr.bf16.mxu1 %v1142_v0 }
 0x2d5   :  { %1083 = vmatpush3.bf16.msra.mxu1 %v1237_v11 }
 0x2d6   :  { %1084 = vmatprep.subr.bf16.mxu1 %v1142_v0 }
 0x2d9   :  { %1085 = vmatpush3.bf16.msra.mxu1 %v1249_v12 }
 0x2da   :  { %1086 = vmatprep.subr.bf16.mxu1 %v1142_v0 }
 0x2dd   :  { %1087 = vmatpush3.bf16.msra.mxu1 %v1259_v13 }
 0x393   :  { %v573_v25 = vpop.f32.mrb[16].mxu1 }
 0x394   :  { %v574_v8 = vadd.f32 %v1359_v37, %v573_v25  ;;  %v1046_v26 = vpop.f32.mrb[17].mxu1 }
 0x395   :  { %v576_v10 = vpop.f32.mrb[18].mxu1 }
 0x396   :  { %v579_v27 = vmax.f32 %v574_v8, 0.0  ;;  %v1047_v28 = vpop.f32.mrb[19].mxu1 }
 0x398   :  { %v580_v29 = vpack.c.bf16 %v579_v27, %v579_v27 }
 0x39a   :  { %1065 = vmatmul.mubr.bf16.vlgmr.msra.gmra.mrb[12].mxu0 %v580_v29 }
 0x39b   :  { %1093 = vmatpush3.bf16.msra.mxu0 %v1266_v14  ;;  %1108 = vmatprep.mubr.msk.bf16.mxu0 %vm1143_vm0, %v1142_v0 }
 0x39c   :  { %1094 = vmatprep.subr.bf16.mxu0 %v1142_v0 }
 0x39f   :  { %1095 = vmatpush3.bf16.msra.mxu0 %v1271_v15 }
 0x3a0   :  { %1096 = vmatprep.subr.bf16.mxu0 %v1142_v0 }
 0x3a3   :  { %v689_v11 = vpop.f32.mrb[20].mxu1  ;;  %1097 = vmatpush3.bf16.msra.mxu0 %v1280_v16 }
 0x3a4   :  { %v690_v12 = vadd.f32 %v1308_v20, %v689_v11  ;;  %v1078_v13 = vpop.f32.mrb[21].mxu1  ;;  %1098 = vmatprep.subr.bf16.mxu0 %v1142_v0 }
 0x3a5   :  { %v692_v30 = vpop.f32.mrb[22].mxu1 }
 0x3a6   :  { %v695_v31 = vmax.f32 %v690_v12, 0.0  ;;  %v1079_v14 = vpop.f32.mrb[23].mxu1 }
 0x3a7   :  { %1099 = vmatpush3.bf16.msra.mxu0 %v1287_v17 }
 0x3a8   :  { %v696_v32 = vpack.c.bf16 %v695_v31, %v695_v31  ;;  %1100 = vmatprep.subr.bf16.mxu0 %v1142_v0 }
 0x3aa   :  { %1089 = vmatmul.mubr.msk.bf16.vlgmr.msra.gmra.mrb[24].mxu1 %vm67_vm1, %v696_v32 }
 0x3ab   :  { %1101 = vmatpush3.bf16.msra.mxu0 %v1294_v18 }
 0x3ac   :  { %1102 = vmatprep.subr.bf16.mxu0 %v1142_v0 }
 0x3af   :  { %1103 = vmatpush3.bf16.msra.mxu0 %v1301_v19 }
 0x3b0   :  { %1104 = vmatprep.subr.bf16.mxu0 %v1142_v0 }
 0x3b3   :  { %1105 = vmatpush3.bf16.msra.mxu0 %v1341_v35  ;;  %v786_v35 = vlaneseq }
 0x3b4   :  { %1106 = vmatprep.subr.bf16.mxu0 %v1142_v0  ;;  %v783_v0 = vld [vmem:[%s1478_s6] sm:$0x1] }
 0x3b5   :  { %v787_v42 = vshrl.u32 %v786_v35, 7 }
 0x3b7   :  { %1107 = vmatpush3.bf16.msra.mxu0 %v1350_v36  ;;  %v784_v36 = vmul.f32 4.0, %v783_v0  ;;  %v788_v43 = vsub.s32 0, %v787_v42 }
 0x3b9   :  { %v789_v44 = vrot.slane %v784_v36, %v788_v43 }
 0x46d   :  { %v615_v15 = vpop.f32.mrb[12].mxu0 }
 0x46e   :  { %v621_v16 = vadd.f32 %v615_v15, %v1411_v61  ;;  %v1066_v17 = vpop.f32.mrb[13].mxu0 }
 0x46f   :  { %v618_v20 = vpop.f32.mrb[14].mxu0 }
 0x470   :  { %v1067_v33 = vpop.f32.mrb[15].mxu0 }
 0x47d   :  { %v734_v34 = vpop.f32.mrb[24].mxu1 }
 0x47e   :  { %v735_v18 = vadd.f32 %v1359_v37, %v734_v34  ;;  %v1090_v38 = vpop.f32.mrb[25].mxu1 }
 0x47f   :  { %v737_v39 = vpop.f32.mrb[26].mxu1 }
 0x480   :  { %v740_v19 = vmax.f32 %v735_v18, 0.0  ;;  %v1091_v40 = vpop.f32.mrb[27].mxu1 }
 0x482   :  { %v741_v41 = vpack.c.bf16 %v740_v19, %v740_v19 }
 0x484   :  { %1109 = vmatmul.mubr.bf16.vlgmr.msra.gmra.mrb[16].mxu0 %v741_v41 }
 0x557   :  { %v776_v45 = vpop.f32.mrb[16].mxu0 }
 0x558   :  { %v782_v46 = vadd.f32 %v776_v45, %v621_v16  ;;  %v1110_v47 = vpop.f32.mrb[17].mxu0 }
 0x559   :  { %v779_v48 = vpop.f32.mrb[18].mxu0 }
 0x55a   :  { %v791_v37 = vadd.f32 %v789_v44, %v782_v46  ;;  %v1111_v49 = vpop.f32.mrb[19].mxu0 }
 0x55c   :  { %v792_v50 = vpack.c.bf16 %v791_v37, %v791_v37 }
 0x55e   :  { %793 = vst [vmem:[%s1479_s7] sm:$0xf] %v792_v50 }

</bundles_post_ra>
